<compile_context>
chip_gen: v6e
topology: v6e:2x2x1
jax: 0.10.0
libtpu: 0.0.40
codegen_flags: <defaults>
</compile_context>

<pallas_src>
import math
import functools

import jax
import jax.numpy as jnp
from jax.experimental import pallas as pl
from jax.experimental.pallas import tpu as pltpu

# ---- small config (consistent with the module's forward) -------------------
BATCH = 2
SEQ = 8
HIDDEN = 32
NUM_HEADS = 4
HEAD_SIZE = HIDDEN // NUM_HEADS
DENOM = math.sqrt(HIDDEN)  # module divides by sqrt(hidden_size), not head_size


def _bert_attention_kernel(x_ref, mask_ref, a_ref, c_ref, out_ref, *,
                           batch, seq, num_heads):
    """Fused single-invocation BERT attention.

    x_ref:    (batch*seq, H)          bf16  flattened hidden states
    mask_ref: (batch*num_heads, S, S) f32   additive attention mask
    a_ref:    (num_heads, H, H)       bf16  A[h] = Wq_h @ Wk_h^T / sqrt(H)
    c_ref:    (num_heads, H, H)       bf16  C[h] = Wv_h @ Wo_h
    out_ref:  (batch*seq, H)          f32
    """
    x = x_ref[...]                                       # (B*S, H) bf16
    hidden = x.shape[1]

    # Per-batch f32 accumulators: the module's head-concat + o_proj becomes
    # a sum over heads of attn_bh @ (X_b @ C[h]) -- plain f32 adds, no
    # cross-lane concatenation or per-head lane slicing.
    accs = [jnp.zeros((seq, hidden), jnp.float32) for _ in range(batch)]

    for h in range(num_heads):                           # static unroll (4)
        # Shared per-head projections for all batch rows: one MXU push each.
        t = jnp.dot(x, a_ref[h], preferred_element_type=jnp.float32)  # (B*S,H)
        z = jnp.dot(x, c_ref[h], preferred_element_type=jnp.float32)  # (B*S,H)
        t16 = t.astype(jnp.bfloat16)
        z16 = z.astype(jnp.bfloat16)

        for b in range(batch):                           # static unroll (2)
            r0 = b * seq                                 # 8-row aligned slice
            xb = x[r0:r0 + seq]                          # (S, H) bf16
            tb = t16[r0:r0 + seq]                        # (S, H) bf16
            zb = z16[r0:r0 + seq]                        # (S, H) bf16

            # scores = (X_b @ A_h) @ X_b^T : contract the hidden dim of both.
            scores = jax.lax.dot_general(
                tb, xb,
                dimension_numbers=(((1,), (1,)), ((), ())),
                preferred_element_type=jnp.float32)      # (S, S) f32
            scores = scores + mask_ref[b * num_heads + h]

            # Softmax in f32 (scale already folded into A).
            m = jnp.max(scores, axis=-1, keepdims=True)
            p = jnp.exp(scores - m)
            attn = p * (1.0 / jnp.sum(p, axis=-1, keepdims=True))

            accs[b] = accs[b] + jnp.dot(
                attn.astype(jnp.bfloat16), zb,
                preferred_element_type=jnp.float32)      # (S, H) f32

    for b in range(batch):
        out_ref[pl.ds(b * seq, seq), :] = accs[b].astype(out_ref.dtype)


@functools.partial(jax.jit, static_argnames=("num_heads",))
def bert_attention(hidden_state, attention_mask, wq, wk, wv, wo,
                   num_heads=NUM_HEADS):
    B, S, H = hidden_state.shape
    hd = H // num_heads

    # Pre-fuse per-head weights (f32 math; bf16 operands handed to the MXU):
    #   A[h] = Wq_h @ Wk_h^T / sqrt(H)   -- folds the 1/sqrt(hidden) scale
    #   C[h] = Wv_h @ Wo_h               -- folds head-unsplit + output proj
    wq_h = wq.reshape(H, num_heads, hd)
    wk_h = wk.reshape(H, num_heads, hd)
    wv_h = wv.reshape(H, num_heads, hd)
    wo_h = wo.reshape(num_heads, hd, H)
    a = jnp.einsum("ind,jnd->nij", wq_h, wk_h) / math.sqrt(H)  # (nh, H, H)
    c = jnp.einsum("ind,ndj->nij", wv_h, wo_h)                 # (nh, H, H)

    x2d = hidden_state.reshape(B * S, H)

    vmem = functools.partial(pl.BlockSpec, memory_space=pltpu.MemorySpace.VMEM)
    kernel = functools.partial(_bert_attention_kernel,
                               batch=B, seq=S, num_heads=num_heads)

    out2d = pl.pallas_call(
        kernel,
        out_shape=jax.ShapeDtypeStruct((B * S, H), jnp.float32),
        in_specs=[vmem(), vmem(), vmem(), vmem()],
        out_specs=vmem(),
    )(
        x2d.astype(jnp.bfloat16),
        attention_mask.astype(jnp.float32),
        a.astype(jnp.bfloat16),
        c.astype(jnp.bfloat16),
    )
    return out2d.reshape(B, S, H).astype(hidden_state.dtype)


def _reference(hidden_state, attention_mask, wq, wk, wv, wo,
               num_heads=NUM_HEADS):
    """Pure-JAX f32 reference mirroring the PyTorch forward."""
    B, S, H = hidden_state.shape
    hd = H // num_heads
    q = hidden_state @ wq
    k = hidden_state @ wk
    v = hidden_state @ wv

    def split_heads(x):
        x = x.reshape(B, S, num_heads, hd)
        x = jnp.transpose(x, (0, 2, 1, 3))
        return x.reshape(B * num_heads, S, hd)

    q, k, v = split_heads(q), split_heads(k), split_heads(v)
    qk = jnp.einsum("bsd,btd->bst", q, k) / math.sqrt(H)
    qk = qk + attention_mask
    attn = jax.nn.softmax(qk, axis=-1)
    vs = jnp.einsum("bst,btd->bsd", attn, v)
    vs = vs.reshape(B, num_heads, S, hd)
    vs = jnp.transpose(vs, (0, 2, 1, 3)).reshape(B, S, H)
    return vs @ wo


if __name__ == "__main__":
    key = jax.random.PRNGKey(0)
    k_h, k_m, k_q, k_k, k_v, k_o = jax.random.split(key, 6)

    hidden_state = jax.random.normal(k_h, (BATCH, SEQ, HIDDEN), jnp.float32)

    # attention mask: 0 for visible, -1e9 for masked (deterministic pattern)
    mask_bits = (jax.random.uniform(k_m, (BATCH * NUM_HEADS, SEQ, SEQ)) < 0.2)
    attention_mask = jnp.where(mask_bits, -1e9, 0.0).astype(jnp.float32)

    # deterministic parameter init (fan-in scaled), stored as (in, out)
    scale = 1.0 / math.sqrt(HIDDEN)
    wq = jax.random.normal(k_q, (HIDDEN, HIDDEN), jnp.float32) * scale
    wk = jax.random.normal(k_k, (HIDDEN, HIDDEN), jnp.float32) * scale
    wv = jax.random.normal(k_v, (HIDDEN, HIDDEN), jnp.float32) * scale
    wo = jax.random.normal(k_o, (HIDDEN, HIDDEN), jnp.float32) * scale

    out = bert_attention(hidden_state, attention_mask, wq, wk, wv, wo)
    out = jax.block_until_ready(out)

    ref = _reference(hidden_state, attention_mask, wq, wk, wv, wo)
    assert out.shape == (BATCH, SEQ, HIDDEN)
    # bf16 MXU operands with f32 accumulation: ~3 significant decimal digits,
    # so compare against the pure-f32 reference at a bf16-class tolerance.
    assert jnp.allclose(out, ref, atol=2e-2, rtol=2e-2), "mismatch vs reference"

    print("KERNEL_OK")
</pallas_src>

<mosaic_0001>
module attributes {stable_mosaic.version = 11 : i64} {
  func.func @_bert_attention_kernel(%arg0: memref<16x32xbf16, #tpu.memory_space<vmem>>, %arg1: memref<8x8x8xf32, #tpu.memory_space<vmem>>, %arg2: memref<4x32x32xbf16, #tpu.memory_space<vmem>>, %arg3: memref<4x32x32xbf16, #tpu.memory_space<vmem>>, %arg4: memref<16x32xf32, #tpu.memory_space<vmem>>) attributes {dimension_semantics = [], scalar_prefetch = 0 : i64, scratch_operands = 0 : i64, tpu.core_type = #tpu.core_type<tc>} {
    %c0 = arith.constant 0 : index
    %c0_0 = arith.constant 0 : index
    %0 = vector.load %arg0[%c0, %c0_0] : memref<16x32xbf16, #tpu.memory_space<vmem>>, vector<16x32xbf16>
    %cst = arith.constant 0.000000e+00 : f32
    %1 = vector.broadcast %cst : f32 to vector<8x32xf32>
    %cst_1 = arith.constant 0.000000e+00 : f32
    %2 = vector.broadcast %cst_1 : f32 to vector<8x32xf32>
    %c0_2 = arith.constant 0 : index
    %c0_3 = arith.constant 0 : index
    %c0_4 = arith.constant 0 : index
    %3 = vector.load %arg2[%c0_2, %c0_3, %c0_4] : memref<4x32x32xbf16, #tpu.memory_space<vmem>>, vector<1x32x32xbf16>
    %4 = vector.shape_cast %3 : vector<1x32x32xbf16> to vector<32x32xbf16>
    %cst_5 = arith.constant dense<0.000000e+00> : vector<16x32xf32>
    %5 = tpu.matmul %0, %4, %cst_5 {dimension_numbers = #tpu.dot_dimension_numbers<[1], [0], [0], [1], [0, 0, 1, 1], [], []>} : vector<16x32xbf16>, vector<32x32xbf16>, vector<16x32xf32> -> vector<16x32xf32>
    %c0_6 = arith.constant 0 : index
    %c0_7 = arith.constant 0 : index
    %c0_8 = arith.constant 0 : index
    %6 = vector.load %arg3[%c0_6, %c0_7, %c0_8] : memref<4x32x32xbf16, #tpu.memory_space<vmem>>, vector<1x32x32xbf16>
    %7 = vector.shape_cast %6 : vector<1x32x32xbf16> to vector<32x32xbf16>
    %cst_9 = arith.constant dense<0.000000e+00> : vector<16x32xf32>
    %8 = tpu.matmul %0, %7, %cst_9 {dimension_numbers = #tpu.dot_dimension_numbers<[1], [0], [0], [1], [0, 0, 1, 1], [], []>} : vector<16x32xbf16>, vector<32x32xbf16>, vector<16x32xf32> -> vector<16x32xf32>
    %9 = arith.truncf %5 : vector<16x32xf32> to vector<16x32xbf16>
    %10 = arith.truncf %8 : vector<16x32xf32> to vector<16x32xbf16>
    %11 = vector.extract_strided_slice %0 {offsets = [0, 0], sizes = [8, 32], strides = [1, 1]} : vector<16x32xbf16> to vector<8x32xbf16>
    %12 = vector.extract_strided_slice %9 {offsets = [0, 0], sizes = [8, 32], strides = [1, 1]} : vector<16x32xbf16> to vector<8x32xbf16>
    %13 = vector.extract_strided_slice %10 {offsets = [0, 0], sizes = [8, 32], strides = [1, 1]} : vector<16x32xbf16> to vector<8x32xbf16>
    %cst_10 = arith.constant dense<0.000000e+00> : vector<8x8xf32>
    %14 = tpu.matmul %12, %11, %cst_10 {dimension_numbers = #tpu.dot_dimension_numbers<[1], [1], [0], [0], [0, 0, 1, 0], [], []>} : vector<8x32xbf16>, vector<8x32xbf16>, vector<8x8xf32> -> vector<8x8xf32>
    %c0_11 = arith.constant 0 : index
    %c0_12 = arith.constant 0 : index
    %c0_13 = arith.constant 0 : index
    %15 = vector.load %arg1[%c0_11, %c0_12, %c0_13] : memref<8x8x8xf32, #tpu.memory_space<vmem>>, vector<1x8x8xf32>
    %16 = vector.shape_cast %15 : vector<1x8x8xf32> to vector<8x8xf32>
    %17 = arith.addf %14, %16 : vector<8x8xf32>
    %cst_14 = arith.constant dense<0xFF800000> : vector<8xf32>
    %18 = vector.multi_reduction <maximumf>, %17, %cst_14 [1] : vector<8x8xf32> to vector<8xf32>
    %19 = vector.shape_cast %18 : vector<8xf32> to vector<8x1xf32>
    %20 = vector.broadcast %19 : vector<8x1xf32> to vector<8x8xf32>
    %21 = arith.subf %17, %20 : vector<8x8xf32>
    %22 = math.exp %21 : vector<8x8xf32>
    %cst_15 = arith.constant dense<0.000000e+00> : vector<8xf32>
    %23 = vector.multi_reduction <add>, %22, %cst_15 [1] : vector<8x8xf32> to vector<8xf32>
    %24 = vector.shape_cast %23 : vector<8xf32> to vector<8x1xf32>
    %cst_16 = arith.constant 1.000000e+00 : f32
    %25 = vector.broadcast %cst_16 : f32 to vector<8x1xf32>
    %26 = arith.divf %25, %24 : vector<8x1xf32>
    %27 = vector.broadcast %26 : vector<8x1xf32> to vector<8x8xf32>
    %28 = arith.mulf %22, %27 : vector<8x8xf32>
    %29 = arith.truncf %28 : vector<8x8xf32> to vector<8x8xbf16>
    %cst_17 = arith.constant dense<0.000000e+00> : vector<8x32xf32>
    %30 = tpu.matmul %29, %13, %cst_17 {dimension_numbers = #tpu.dot_dimension_numbers<[1], [0], [0], [1], [0, 0, 1, 1], [], []>} : vector<8x8xbf16>, vector<8x32xbf16>, vector<8x32xf32> -> vector<8x32xf32>
    %31 = arith.addf %1, %30 : vector<8x32xf32>
    %32 = vector.extract_strided_slice %0 {offsets = [8, 0], sizes = [8, 32], strides = [1, 1]} : vector<16x32xbf16> to vector<8x32xbf16>
    %33 = vector.extract_strided_slice %9 {offsets = [8, 0], sizes = [8, 32], strides = [1, 1]} : vector<16x32xbf16> to vector<8x32xbf16>
    %34 = vector.extract_strided_slice %10 {offsets = [8, 0], sizes = [8, 32], strides = [1, 1]} : vector<16x32xbf16> to vector<8x32xbf16>
    %cst_18 = arith.constant dense<0.000000e+00> : vector<8x8xf32>
    %35 = tpu.matmul %33, %32, %cst_18 {dimension_numbers = #tpu.dot_dimension_numbers<[1], [1], [0], [0], [0, 0, 1, 0], [], []>} : vector<8x32xbf16>, vector<8x32xbf16>, vector<8x8xf32> -> vector<8x8xf32>
    %c4 = arith.constant 4 : index
    %c0_19 = arith.constant 0 : index
    %c0_20 = arith.constant 0 : index
    %36 = vector.load %arg1[%c4, %c0_19, %c0_20] : memref<8x8x8xf32, #tpu.memory_space<vmem>>, vector<1x8x8xf32>
    %37 = vector.shape_cast %36 : vector<1x8x8xf32> to vector<8x8xf32>
    %38 = arith.addf %35, %37 : vector<8x8xf32>
    %cst_21 = arith.constant dense<0xFF800000> : vector<8xf32>
    %39 = vector.multi_reduction <maximumf>, %38, %cst_21 [1] : vector<8x8xf32> to vector<8xf32>
    %40 = vector.shape_cast %39 : vector<8xf32> to vector<8x1xf32>
    %41 = vector.broadcast %40 : vector<8x1xf32> to vector<8x8xf32>
    %42 = arith.subf %38, %41 : vector<8x8xf32>
    %43 = math.exp %42 : vector<8x8xf32>
    %cst_22 = arith.constant dense<0.000000e+00> : vector<8xf32>
    %44 = vector.multi_reduction <add>, %43, %cst_22 [1] : vector<8x8xf32> to vector<8xf32>
    %45 = vector.shape_cast %44 : vector<8xf32> to vector<8x1xf32>
    %cst_23 = arith.constant 1.000000e+00 : f32
    %46 = vector.broadcast %cst_23 : f32 to vector<8x1xf32>
    %47 = arith.divf %46, %45 : vector<8x1xf32>
    %48 = vector.broadcast %47 : vector<8x1xf32> to vector<8x8xf32>
    %49 = arith.mulf %43, %48 : vector<8x8xf32>
    %50 = arith.truncf %49 : vector<8x8xf32> to vector<8x8xbf16>
    %cst_24 = arith.constant dense<0.000000e+00> : vector<8x32xf32>
    %51 = tpu.matmul %50, %34, %cst_24 {dimension_numbers = #tpu.dot_dimension_numbers<[1], [0], [0], [1], [0, 0, 1, 1], [], []>} : vector<8x8xbf16>, vector<8x32xbf16>, vector<8x32xf32> -> vector<8x32xf32>
    %52 = arith.addf %2, %51 : vector<8x32xf32>
    %c1 = arith.constant 1 : index
    %c0_25 = arith.constant 0 : index
    %c0_26 = arith.constant 0 : index
    %53 = vector.load %arg2[%c1, %c0_25, %c0_26] : memref<4x32x32xbf16, #tpu.memory_space<vmem>>, vector<1x32x32xbf16>
    %54 = vector.shape_cast %53 : vector<1x32x32xbf16> to vector<32x32xbf16>
    %cst_27 = arith.constant dense<0.000000e+00> : vector<16x32xf32>
    %55 = tpu.matmul %0, %54, %cst_27 {dimension_numbers = #tpu.dot_dimension_numbers<[1], [0], [0], [1], [0, 0, 1, 1], [], []>} : vector<16x32xbf16>, vector<32x32xbf16>, vector<16x32xf32> -> vector<16x32xf32>
    %c1_28 = arith.constant 1 : index
    %c0_29 = arith.constant 0 : index
    %c0_30 = arith.constant 0 : index
    %56 = vector.load %arg3[%c1_28, %c0_29, %c0_30] : memref<4x32x32xbf16, #tpu.memory_space<vmem>>, vector<1x32x32xbf16>
    %57 = vector.shape_cast %56 : vector<1x32x32xbf16> to vector<32x32xbf16>
    %cst_31 = arith.constant dense<0.000000e+00> : vector<16x32xf32>
    %58 = tpu.matmul %0, %57, %cst_31 {dimension_numbers = #tpu.dot_dimension_numbers<[1], [0], [0], [1], [0, 0, 1, 1], [], []>} : vector<16x32xbf16>, vector<32x32xbf16>, vector<16x32xf32> -> vector<16x32xf32>
    %59 = arith.truncf %55 : vector<16x32xf32> to vector<16x32xbf16>
    %60 = arith.truncf %58 : vector<16x32xf32> to vector<16x32xbf16>
    %61 = vector.extract_strided_slice %0 {offsets = [0, 0], sizes = [8, 32], strides = [1, 1]} : vector<16x32xbf16> to vector<8x32xbf16>
    %62 = vector.extract_strided_slice %59 {offsets = [0, 0], sizes = [8, 32], strides = [1, 1]} : vector<16x32xbf16> to vector<8x32xbf16>
    %63 = vector.extract_strided_slice %60 {offsets = [0, 0], sizes = [8, 32], strides = [1, 1]} : vector<16x32xbf16> to vector<8x32xbf16>
    %cst_32 = arith.constant dense<0.000000e+00> : vector<8x8xf32>
    %64 = tpu.matmul %62, %61, %cst_32 {dimension_numbers = #tpu.dot_dimension_numbers<[1], [1], [0], [0], [0, 0, 1, 0], [], []>} : vector<8x32xbf16>, vector<8x32xbf16>, vector<8x8xf32> -> vector<8x8xf32>
    %c1_33 = arith.constant 1 : index
    %c0_34 = arith.constant 0 : index
    %c0_35 = arith.constant 0 : index
    %65 = vector.load %arg1[%c1_33, %c0_34, %c0_35] : memref<8x8x8xf32, #tpu.memory_space<vmem>>, vector<1x8x8xf32>
    %66 = vector.shape_cast %65 : vector<1x8x8xf32> to vector<8x8xf32>
    %67 = arith.addf %64, %66 : vector<8x8xf32>
    %cst_36 = arith.constant dense<0xFF800000> : vector<8xf32>
    %68 = vector.multi_reduction <maximumf>, %67, %cst_36 [1] : vector<8x8xf32> to vector<8xf32>
    %69 = vector.shape_cast %68 : vector<8xf32> to vector<8x1xf32>
    %70 = vector.broadcast %69 : vector<8x1xf32> to vector<8x8xf32>
    %71 = arith.subf %67, %70 : vector<8x8xf32>
    %72 = math.exp %71 : vector<8x8xf32>
    %cst_37 = arith.constant dense<0.000000e+00> : vector<8xf32>
    %73 = vector.multi_reduction <add>, %72, %cst_37 [1] : vector<8x8xf32> to vector<8xf32>
    %74 = vector.shape_cast %73 : vector<8xf32> to vector<8x1xf32>
    %cst_38 = arith.constant 1.000000e+00 : f32
    %75 = vector.broadcast %cst_38 : f32 to vector<8x1xf32>
    %76 = arith.divf %75, %74 : vector<8x1xf32>
    %77 = vector.broadcast %76 : vector<8x1xf32> to vector<8x8xf32>
    %78 = arith.mulf %72, %77 : vector<8x8xf32>
    %79 = arith.truncf %78 : vector<8x8xf32> to vector<8x8xbf16>
    %cst_39 = arith.constant dense<0.000000e+00> : vector<8x32xf32>
    %80 = tpu.matmul %79, %63, %cst_39 {dimension_numbers = #tpu.dot_dimension_numbers<[1], [0], [0], [1], [0, 0, 1, 1], [], []>} : vector<8x8xbf16>, vector<8x32xbf16>, vector<8x32xf32> -> vector<8x32xf32>
    %81 = arith.addf %31, %80 : vector<8x32xf32>
    %82 = vector.extract_strided_slice %0 {offsets = [8, 0], sizes = [8, 32], strides = [1, 1]} : vector<16x32xbf16> to vector<8x32xbf16>
    %83 = vector.extract_strided_slice %59 {offsets = [8, 0], sizes = [8, 32], strides = [1, 1]} : vector<16x32xbf16> to vector<8x32xbf16>
    %84 = vector.extract_strided_slice %60 {offsets = [8, 0], sizes = [8, 32], strides = [1, 1]} : vector<16x32xbf16> to vector<8x32xbf16>
    %cst_40 = arith.constant dense<0.000000e+00> : vector<8x8xf32>
    %85 = tpu.matmul %83, %82, %cst_40 {dimension_numbers = #tpu.dot_dimension_numbers<[1], [1], [0], [0], [0, 0, 1, 0], [], []>} : vector<8x32xbf16>, vector<8x32xbf16>, vector<8x8xf32> -> vector<8x8xf32>
    %c5 = arith.constant 5 : index
    %c0_41 = arith.constant 0 : index
    %c0_42 = arith.constant 0 : index
    %86 = vector.load %arg1[%c5, %c0_41, %c0_42] : memref<8x8x8xf32, #tpu.memory_space<vmem>>, vector<1x8x8xf32>
    %87 = vector.shape_cast %86 : vector<1x8x8xf32> to vector<8x8xf32>
    %88 = arith.addf %85, %87 : vector<8x8xf32>
    %cst_43 = arith.constant dense<0xFF800000> : vector<8xf32>
    %89 = vector.multi_reduction <maximumf>, %88, %cst_43 [1] : vector<8x8xf32> to vector<8xf32>
    %90 = vector.shape_cast %89 : vector<8xf32> to vector<8x1xf32>
    %91 = vector.broadcast %90 : vector<8x1xf32> to vector<8x8xf32>
    %92 = arith.subf %88, %91 : vector<8x8xf32>
    %93 = math.exp %92 : vector<8x8xf32>
    %cst_44 = arith.constant dense<0.000000e+00> : vector<8xf32>
    %94 = vector.multi_reduction <add>, %93, %cst_44 [1] : vector<8x8xf32> to vector<8xf32>
    %95 = vector.shape_cast %94 : vector<8xf32> to vector<8x1xf32>
    %cst_45 = arith.constant 1.000000e+00 : f32
    %96 = vector.broadcast %cst_45 : f32 to vector<8x1xf32>
    %97 = arith.divf %96, %95 : vector<8x1xf32>
    %98 = vector.broadcast %97 : vector<8x1xf32> to vector<8x8xf32>
    %99 = arith.mulf %93, %98 : vector<8x8xf32>
    %100 = arith.truncf %99 : vector<8x8xf32> to vector<8x8xbf16>
    %cst_46 = arith.constant dense<0.000000e+00> : vector<8x32xf32>
    %101 = tpu.matmul %100, %84, %cst_46 {dimension_numbers = #tpu.dot_dimension_numbers<[1], [0], [0], [1], [0, 0, 1, 1], [], []>} : vector<8x8xbf16>, vector<8x32xbf16>, vector<8x32xf32> -> vector<8x32xf32>
    %102 = arith.addf %52, %101 : vector<8x32xf32>
    %c2 = arith.constant 2 : index
    %c0_47 = arith.constant 0 : index
    %c0_48 = arith.constant 0 : index
    %103 = vector.load %arg2[%c2, %c0_47, %c0_48] : memref<4x32x32xbf16, #tpu.memory_space<vmem>>, vector<1x32x32xbf16>
    %104 = vector.shape_cast %103 : vector<1x32x32xbf16> to vector<32x32xbf16>
    %cst_49 = arith.constant dense<0.000000e+00> : vector<16x32xf32>
    %105 = tpu.matmul %0, %104, %cst_49 {dimension_numbers = #tpu.dot_dimension_numbers<[1], [0], [0], [1], [0, 0, 1, 1], [], []>} : vector<16x32xbf16>, vector<32x32xbf16>, vector<16x32xf32> -> vector<16x32xf32>
    %c2_50 = arith.constant 2 : index
    %c0_51 = arith.constant 0 : index
    %c0_52 = arith.constant 0 : index
    %106 = vector.load %arg3[%c2_50, %c0_51, %c0_52] : memref<4x32x32xbf16, #tpu.memory_space<vmem>>, vector<1x32x32xbf16>
    %107 = vector.shape_cast %106 : vector<1x32x32xbf16> to vector<32x32xbf16>
    %cst_53 = arith.constant dense<0.000000e+00> : vector<16x32xf32>
    %108 = tpu.matmul %0, %107, %cst_53 {dimension_numbers = #tpu.dot_dimension_numbers<[1], [0], [0], [1], [0, 0, 1, 1], [], []>} : vector<16x32xbf16>, vector<32x32xbf16>, vector<16x32xf32> -> vector<16x32xf32>
    %109 = arith.truncf %105 : vector<16x32xf32> to vector<16x32xbf16>
    %110 = arith.truncf %108 : vector<16x32xf32> to vector<16x32xbf16>
    %111 = vector.extract_strided_slice %0 {offsets = [0, 0], sizes = [8, 32], strides = [1, 1]} : vector<16x32xbf16> to vector<8x32xbf16>
    %112 = vector.extract_strided_slice %109 {offsets = [0, 0], sizes = [8, 32], strides = [1, 1]} : vector<16x32xbf16> to vector<8x32xbf16>
    %113 = vector.extract_strided_slice %110 {offsets = [0, 0], sizes = [8, 32], strides = [1, 1]} : vector<16x32xbf16> to vector<8x32xbf16>
    %cst_54 = arith.constant dense<0.000000e+00> : vector<8x8xf32>
    %114 = tpu.matmul %112, %111, %cst_54 {dimension_numbers = #tpu.dot_dimension_numbers<[1], [1], [0], [0], [0, 0, 1, 0], [], []>} : vector<8x32xbf16>, vector<8x32xbf16>, vector<8x8xf32> -> vector<8x8xf32>
    %c2_55 = arith.constant 2 : index
    %c0_56 = arith.constant 0 : index
    %c0_57 = arith.constant 0 : index
    %115 = vector.load %arg1[%c2_55, %c0_56, %c0_57] : memref<8x8x8xf32, #tpu.memory_space<vmem>>, vector<1x8x8xf32>
    %116 = vector.shape_cast %115 : vector<1x8x8xf32> to vector<8x8xf32>
    %117 = arith.addf %114, %116 : vector<8x8xf32>
    %cst_58 = arith.constant dense<0xFF800000> : vector<8xf32>
    %118 = vector.multi_reduction <maximumf>, %117, %cst_58 [1] : vector<8x8xf32> to vector<8xf32>
    %119 = vector.shape_cast %118 : vector<8xf32> to vector<8x1xf32>
    %120 = vector.broadcast %119 : vector<8x1xf32> to vector<8x8xf32>
    %121 = arith.subf %117, %120 : vector<8x8xf32>
    %122 = math.exp %121 : vector<8x8xf32>
    %cst_59 = arith.constant dense<0.000000e+00> : vector<8xf32>
    %123 = vector.multi_reduction <add>, %122, %cst_59 [1] : vector<8x8xf32> to vector<8xf32>
    %124 = vector.shape_cast %123 : vector<8xf32> to vector<8x1xf32>
    %cst_60 = arith.constant 1.000000e+00 : f32
    %125 = vector.broadcast %cst_60 : f32 to vector<8x1xf32>
    %126 = arith.divf %125, %124 : vector<8x1xf32>
    %127 = vector.broadcast %126 : vector<8x1xf32> to vector<8x8xf32>
    %128 = arith.mulf %122, %127 : vector<8x8xf32>
    %129 = arith.truncf %128 : vector<8x8xf32> to vector<8x8xbf16>
    %cst_61 = arith.constant dense<0.000000e+00> : vector<8x32xf32>
    %130 = tpu.matmul %129, %113, %cst_61 {dimension_numbers = #tpu.dot_dimension_numbers<[1], [0], [0], [1], [0, 0, 1, 1], [], []>} : vector<8x8xbf16>, vector<8x32xbf16>, vector<8x32xf32> -> vector<8x32xf32>
    %131 = arith.addf %81, %130 : vector<8x32xf32>
    %132 = vector.extract_strided_slice %0 {offsets = [8, 0], sizes = [8, 32], strides = [1, 1]} : vector<16x32xbf16> to vector<8x32xbf16>
    %133 = vector.extract_strided_slice %109 {offsets = [8, 0], sizes = [8, 32], strides = [1, 1]} : vector<16x32xbf16> to vector<8x32xbf16>
    %134 = vector.extract_strided_slice %110 {offsets = [8, 0], sizes = [8, 32], strides = [1, 1]} : vector<16x32xbf16> to vector<8x32xbf16>
    %cst_62 = arith.constant dense<0.000000e+00> : vector<8x8xf32>
    %135 = tpu.matmul %133, %132, %cst_62 {dimension_numbers = #tpu.dot_dimension_numbers<[1], [1], [0], [0], [0, 0, 1, 0], [], []>} : vector<8x32xbf16>, vector<8x32xbf16>, vector<8x8xf32> -> vector<8x8xf32>
    %c6 = arith.constant 6 : index
    %c0_63 = arith.constant 0 : index
    %c0_64 = arith.constant 0 : index
    %136 = vector.load %arg1[%c6, %c0_63, %c0_64] : memref<8x8x8xf32, #tpu.memory_space<vmem>>, vector<1x8x8xf32>
    %137 = vector.shape_cast %136 : vector<1x8x8xf32> to vector<8x8xf32>
    %138 = arith.addf %135, %137 : vector<8x8xf32>
    %cst_65 = arith.constant dense<0xFF800000> : vector<8xf32>
    %139 = vector.multi_reduction <maximumf>, %138, %cst_65 [1] : vector<8x8xf32> to vector<8xf32>
    %140 = vector.shape_cast %139 : vector<8xf32> to vector<8x1xf32>
    %141 = vector.broadcast %140 : vector<8x1xf32> to vector<8x8xf32>
    %142 = arith.subf %138, %141 : vector<8x8xf32>
    %143 = math.exp %142 : vector<8x8xf32>
    %cst_66 = arith.constant dense<0.000000e+00> : vector<8xf32>
    %144 = vector.multi_reduction <add>, %143, %cst_66 [1] : vector<8x8xf32> to vector<8xf32>
    %145 = vector.shape_cast %144 : vector<8xf32> to vector<8x1xf32>
    %cst_67 = arith.constant 1.000000e+00 : f32
    %146 = vector.broadcast %cst_67 : f32 to vector<8x1xf32>
    %147 = arith.divf %146, %145 : vector<8x1xf32>
    %148 = vector.broadcast %147 : vector<8x1xf32> to vector<8x8xf32>
    %149 = arith.mulf %143, %148 : vector<8x8xf32>
    %150 = arith.truncf %149 : vector<8x8xf32> to vector<8x8xbf16>
    %cst_68 = arith.constant dense<0.000000e+00> : vector<8x32xf32>
    %151 = tpu.matmul %150, %134, %cst_68 {dimension_numbers = #tpu.dot_dimension_numbers<[1], [0], [0], [1], [0, 0, 1, 1], [], []>} : vector<8x8xbf16>, vector<8x32xbf16>, vector<8x32xf32> -> vector<8x32xf32>
    %152 = arith.addf %102, %151 : vector<8x32xf32>
    %c3 = arith.constant 3 : index
    %c0_69 = arith.constant 0 : index
    %c0_70 = arith.constant 0 : index
    %153 = vector.load %arg2[%c3, %c0_69, %c0_70] : memref<4x32x32xbf16, #tpu.memory_space<vmem>>, vector<1x32x32xbf16>
    %154 = vector.shape_cast %153 : vector<1x32x32xbf16> to vector<32x32xbf16>
    %cst_71 = arith.constant dense<0.000000e+00> : vector<16x32xf32>
    %155 = tpu.matmul %0, %154, %cst_71 {dimension_numbers = #tpu.dot_dimension_numbers<[1], [0], [0], [1], [0, 0, 1, 1], [], []>} : vector<16x32xbf16>, vector<32x32xbf16>, vector<16x32xf32> -> vector<16x32xf32>
    %c3_72 = arith.constant 3 : index
    %c0_73 = arith.constant 0 : index
    %c0_74 = arith.constant 0 : index
    %156 = vector.load %arg3[%c3_72, %c0_73, %c0_74] : memref<4x32x32xbf16, #tpu.memory_space<vmem>>, vector<1x32x32xbf16>
    %157 = vector.shape_cast %156 : vector<1x32x32xbf16> to vector<32x32xbf16>
    %cst_75 = arith.constant dense<0.000000e+00> : vector<16x32xf32>
    %158 = tpu.matmul %0, %157, %cst_75 {dimension_numbers = #tpu.dot_dimension_numbers<[1], [0], [0], [1], [0, 0, 1, 1], [], []>} : vector<16x32xbf16>, vector<32x32xbf16>, vector<16x32xf32> -> vector<16x32xf32>
    %159 = arith.truncf %155 : vector<16x32xf32> to vector<16x32xbf16>
    %160 = arith.truncf %158 : vector<16x32xf32> to vector<16x32xbf16>
    %161 = vector.extract_strided_slice %0 {offsets = [0, 0], sizes = [8, 32], strides = [1, 1]} : vector<16x32xbf16> to vector<8x32xbf16>
    %162 = vector.extract_strided_slice %159 {offsets = [0, 0], sizes = [8, 32], strides = [1, 1]} : vector<16x32xbf16> to vector<8x32xbf16>
    %163 = vector.extract_strided_slice %160 {offsets = [0, 0], sizes = [8, 32], strides = [1, 1]} : vector<16x32xbf16> to vector<8x32xbf16>
    %cst_76 = arith.constant dense<0.000000e+00> : vector<8x8xf32>
    %164 = tpu.matmul %162, %161, %cst_76 {dimension_numbers = #tpu.dot_dimension_numbers<[1], [1], [0], [0], [0, 0, 1, 0], [], []>} : vector<8x32xbf16>, vector<8x32xbf16>, vector<8x8xf32> -> vector<8x8xf32>
    %c3_77 = arith.constant 3 : index
    %c0_78 = arith.constant 0 : index
    %c0_79 = arith.constant 0 : index
    %165 = vector.load %arg1[%c3_77, %c0_78, %c0_79] : memref<8x8x8xf32, #tpu.memory_space<vmem>>, vector<1x8x8xf32>
    %166 = vector.shape_cast %165 : vector<1x8x8xf32> to vector<8x8xf32>
    %167 = arith.addf %164, %166 : vector<8x8xf32>
    %cst_80 = arith.constant dense<0xFF800000> : vector<8xf32>
    %168 = vector.multi_reduction <maximumf>, %167, %cst_80 [1] : vector<8x8xf32> to vector<8xf32>
    %169 = vector.shape_cast %168 : vector<8xf32> to vector<8x1xf32>
    %170 = vector.broadcast %169 : vector<8x1xf32> to vector<8x8xf32>
    %171 = arith.subf %167, %170 : vector<8x8xf32>
    %172 = math.exp %171 : vector<8x8xf32>
    %cst_81 = arith.constant dense<0.000000e+00> : vector<8xf32>
    %173 = vector.multi_reduction <add>, %172, %cst_81 [1] : vector<8x8xf32> to vector<8xf32>
    %174 = vector.shape_cast %173 : vector<8xf32> to vector<8x1xf32>
    %cst_82 = arith.constant 1.000000e+00 : f32
    %175 = vector.broadcast %cst_82 : f32 to vector<8x1xf32>
    %176 = arith.divf %175, %174 : vector<8x1xf32>
    %177 = vector.broadcast %176 : vector<8x1xf32> to vector<8x8xf32>
    %178 = arith.mulf %172, %177 : vector<8x8xf32>
    %179 = arith.truncf %178 : vector<8x8xf32> to vector<8x8xbf16>
    %cst_83 = arith.constant dense<0.000000e+00> : vector<8x32xf32>
    %180 = tpu.matmul %179, %163, %cst_83 {dimension_numbers = #tpu.dot_dimension_numbers<[1], [0], [0], [1], [0, 0, 1, 1], [], []>} : vector<8x8xbf16>, vector<8x32xbf16>, vector<8x32xf32> -> vector<8x32xf32>
    %181 = arith.addf %131, %180 : vector<8x32xf32>
    %182 = vector.extract_strided_slice %0 {offsets = [8, 0], sizes = [8, 32], strides = [1, 1]} : vector<16x32xbf16> to vector<8x32xbf16>
    %183 = vector.extract_strided_slice %159 {offsets = [8, 0], sizes = [8, 32], strides = [1, 1]} : vector<16x32xbf16> to vector<8x32xbf16>
    %184 = vector.extract_strided_slice %160 {offsets = [8, 0], sizes = [8, 32], strides = [1, 1]} : vector<16x32xbf16> to vector<8x32xbf16>
    %cst_84 = arith.constant dense<0.000000e+00> : vector<8x8xf32>
    %185 = tpu.matmul %183, %182, %cst_84 {dimension_numbers = #tpu.dot_dimension_numbers<[1], [1], [0], [0], [0, 0, 1, 0], [], []>} : vector<8x32xbf16>, vector<8x32xbf16>, vector<8x8xf32> -> vector<8x8xf32>
    %c7 = arith.constant 7 : index
    %c0_85 = arith.constant 0 : index
    %c0_86 = arith.constant 0 : index
    %186 = vector.load %arg1[%c7, %c0_85, %c0_86] : memref<8x8x8xf32, #tpu.memory_space<vmem>>, vector<1x8x8xf32>
    %187 = vector.shape_cast %186 : vector<1x8x8xf32> to vector<8x8xf32>
    %188 = arith.addf %185, %187 : vector<8x8xf32>
    %cst_87 = arith.constant dense<0xFF800000> : vector<8xf32>
    %189 = vector.multi_reduction <maximumf>, %188, %cst_87 [1] : vector<8x8xf32> to vector<8xf32>
    %190 = vector.shape_cast %189 : vector<8xf32> to vector<8x1xf32>
    %191 = vector.broadcast %190 : vector<8x1xf32> to vector<8x8xf32>
    %192 = arith.subf %188, %191 : vector<8x8xf32>
    %193 = math.exp %192 : vector<8x8xf32>
    %cst_88 = arith.constant dense<0.000000e+00> : vector<8xf32>
    %194 = vector.multi_reduction <add>, %193, %cst_88 [1] : vector<8x8xf32> to vector<8xf32>
    %195 = vector.shape_cast %194 : vector<8xf32> to vector<8x1xf32>
    %cst_89 = arith.constant 1.000000e+00 : f32
    %196 = vector.broadcast %cst_89 : f32 to vector<8x1xf32>
    %197 = arith.divf %196, %195 : vector<8x1xf32>
    %198 = vector.broadcast %197 : vector<8x1xf32> to vector<8x8xf32>
    %199 = arith.mulf %193, %198 : vector<8x8xf32>
    %200 = arith.truncf %199 : vector<8x8xf32> to vector<8x8xbf16>
    %cst_90 = arith.constant dense<0.000000e+00> : vector<8x32xf32>
    %201 = tpu.matmul %200, %184, %cst_90 {dimension_numbers = #tpu.dot_dimension_numbers<[1], [0], [0], [1], [0, 0, 1, 1], [], []>} : vector<8x8xbf16>, vector<8x32xbf16>, vector<8x32xf32> -> vector<8x32xf32>
    %202 = arith.addf %152, %201 : vector<8x32xf32>
    %c0_91 = arith.constant 0 : index
    %c0_92 = arith.constant 0 : index
    %203 = vector.load %arg4[%c0_91, %c0_92] : memref<16x32xf32, #tpu.memory_space<vmem>>, vector<8x32xf32>
    tpu.vector_store %arg4[%c0_91, %c0_92], %181 {strides = array<i32>} : memref<16x32xf32, #tpu.memory_space<vmem>>, vector<8x32xf32>,
    %c8 = arith.constant 8 : index
    %c0_93 = arith.constant 0 : index
    %204 = vector.load %arg4[%c8, %c0_93] : memref<16x32xf32, #tpu.memory_space<vmem>>, vector<8x32xf32>
    tpu.vector_store %arg4[%c8, %c0_93], %202 {strides = array<i32>} : memref<16x32xf32, #tpu.memory_space<vmem>>, vector<8x32xf32>,
    return
  }
}

</mosaic_0001>

<bundles_post_ra>
// kernel: bert_attention.1
= control target key start
LH: loop header
LB: loop body
LE: loop exit
PB: predicated region body
PF: predicated region fallthrough
CT: control target
= control target key end

     0   :  { %v1741_v1 = vmov 0.0   ;;  %vm1742_vm0 = vmmov 0   ;;  %vm42_vm1 = vcmask 261120   ;;  %s2020_s0 = inlined_call_operand.vmem [shape: bf16[16,32], index: 0, kind: input, shape index: {}]   ;;  %s2021_s1 = inlined_call_operand.vmem [shape: f32[8,8,8], index: 1, kind: input, shape index: {}]   ;;  %s2022_s2 = inlined_call_operand.vmem [shape: bf16[4,32,32], index: 2, kind: input, shape index: {}]   ;;  %s2023_s3 = inlined_call_operand.vmem [shape: bf16[4,32,32], index: 3, kind: input, shape index: {}]   ;;  %s2024_s4 = inlined_call_operand.hbm [shape: f32[16,32], index: 4, kind: output, shape index: {}]  }
   0x1   :  { %v1670_v0 = vld [vmem:[%s2022_s2 + $0x8] sm:$0xff]   ;;  %1505 = vmatprep.subr.bf16.mxu0 %v1741_v1  ;;  %v1671_v2 = vld [vmem:[%s2022_s2] sm:$0xff]   ;;  %1513 = vmatprep.subr.bf16.mxu1 %v1741_v1 }
   0x2   :  { %1506 = vmatpush3.bf16.msra.mxu0 %v1670_v0  ;;  %1509 = vmatprep.mubr.msk.bf16.mxu0 %vm1742_vm0, %v1741_v1  ;;  %v19_v3 = vld [vmem:[%s2020_s0] sm:$0xf]  ;;  %v20_v4 = vld [vmem:[%s2020_s0 + $0x4] sm:$0xf]  ;;  %v1673_v5 = vld [vmem:[%s2023_s3 + $0x8] sm:$0xff]  }
   0x3   :  { %1507 = vmatprep.subr.bf16.mxu0 %v1741_v1  ;;  %1517 = vmatprep.mubr.msk.bf16.mxu1 %vm1742_vm0, %v1741_v1  ;;  %v1674_v6 = vld [vmem:[%s2023_s3] sm:$0xff]   ;;  %v1796_v7 = vcombine.low %v19_v3, %v20_v4 }
   0x4   :  { %1514 = vmatpush3.bf16.msra.mxu1 %v1673_v5 }
   0x5   :  { %1515 = vmatprep.subr.bf16.mxu1 %v1741_v1 }
   0x6   :  { %1508 = vmatpush3.bf16.msra.mxu0 %v1671_v2 }
   0x7   :  { %1521 = vmatprep.subr.bf16.mxu0 %v1741_v1 }
   0x8   :  { %1516 = vmatpush3.bf16.msra.mxu1 %v1674_v6 }
   0x9   :  { %1510 = vmatmul.mubr.msk.bf16.vlgmr.msra.gmra.mxu0 %vm42_vm1, %v1796_v7  ;;  %1527 = vmatprep.subr.bf16.mxu1 %v1741_v1 }
   0xa   :  { %1523 = vmatprep.mubr.msk.bf16.mxu0 %vm1742_vm0, %v1741_v1 }
   0xb   :  { %1518 = vmatmul.mubr.msk.bf16.vlgmr.msra.gmra.mxu1 %vm42_vm1, %v1796_v7 }
   0xc   :  { %1529 = vmatprep.mubr.msk.bf16.mxu1 %vm1742_vm0, %v1741_v1 }
   0xd   :  { %9 = vsyncpa [#allocation3], 0  ;;  %v1810_v8 = vsel %vm42_vm1, %v19_v3, 0  ;;  %v1814_v9 = vsel %vm42_vm1, %v20_v4, 0  ;;  %v1675_v14 = vld [vmem:[%s2022_s2 + $0x18] sm:$0xff]   ;;  %v1676_v21 = vld [vmem:[%s2022_s2 + $0x10] sm:$0xff]  }
   0xe   :  { %1522 = vmatpush3.bf16.xpose.msra.mxu0 %v1810_v8  ;;  %1528 = vmatpush3.bf16.xpose.msra.mxu1 %v1814_v9  ;;  %v146_v23 = vld [vmem:[%s2021_s1] sm:$0xff]  ;;  %vm193_vm2 = vcmask 64512   ;;  %vm449_vm3 = vcmask 1043456   ;;  %v1677_v40 = vld [vmem:[%s2023_s3 + $0x18] sm:$0xff]   ;;  %v1678_v41 = vld [vmem:[%s2023_s3 + $0x10] sm:$0xff]  }
   0xf   :  { %1533 = vmatprep.subr.bf16.mxu0 %v1741_v1  ;;  %1541 = vmatprep.subr.bf16.mxu1 %v1741_v1  ;;  %v1401_v42 = vld [vmem:[%s2021_s1 + $0x8] sm:$0xff]  ;;  %v1385_v58 = vld [vmem:[%s2021_s1 + $0x20] sm:$0xff] }
  0xc9   :  { %v80_v10 = vpop.f32.mrf.mxu0 }
  0xcb   :  { %v1511_v11 = vpop.f32.mrf.mxu0  ;;  %v137_v12 = vpop.f32.mrf.mxu1 }
  0xcd   :  { %v83_v13 = vpop.f32.mrf.mxu0  ;;  %v1519_v15 = vpop.f32.mrf.mxu1 }
  0xce   :  { %v144_v16 = vpack.c.bf16 %v83_v13, %v80_v10 }
  0xcf   :  { %v1512_v17 = vpop.f32.mrf.mxu0  ;;  %v140_v18 = vpop.f32.mrf.mxu1 }
  0xd0   :  { %v210_v19 = vrot.slane %v144_v16, 4  ;;  %1524 = vmatmul.mubr.msk.bf16.vlgmr.msra.gmra.mxu0 %vm42_vm1, %v144_v16  ;;  %v1823_v20 = vpack.c.bf16 %v140_v18, %v137_v12 }
  0xd1   :  { %1534 = vmatpush3.bf16.msra.mxu0 %v1675_v14  ;;  %1537 = vmatprep.mubr.msk.bf16.mxu0 %vm1742_vm0, %v1741_v1  ;;  %v1520_v22 = vpop.f32.mrf.mxu1 }
  0xd2   :  { %1530 = vmatmul.mubr.msk.bf16.vlgmr.msra.gmra.mxu1 %vm42_vm1, %v210_v19  ;;  %1535 = vmatprep.subr.bf16.mxu0 %v1741_v1  ;;  %v497_v37 = vsel %vm449_vm3, %v1823_v20, 0  ;;  %v648_v17 = vrot.slane %v1823_v20, 4 }
  0xd3   :  { %1545 = vmatprep.mubr.msk.bf16.mxu1 %vm1742_vm0, %v1741_v1  ;;  %1542 = vmatpush3.bf16.msra.mxu1 %v1677_v40 }
  0xd4   :  { %1543 = vmatprep.subr.bf16.mxu1 %v1741_v1 }
  0xd5   :  { %1536 = vmatpush3.bf16.msra.mxu0 %v1676_v21  ;;  %v653_v21 = vsel %vm449_vm3, %v648_v17, 0 }
  0xd6   :  { %1549 = vmatprep.subr.bf16.mxu0 %v1741_v1 }
  0xd7   :  { %1544 = vmatpush3.bf16.msra.mxu1 %v1678_v41 }
  0xd8   :  { %1538 = vmatmul.mubr.msk.bf16.vlgmr.msra.gmra.mxu0 %vm42_vm1, %v1796_v7  ;;  %1555 = vmatprep.subr.bf16.mxu1 %v1741_v1 }
  0xd9   :  { %1550 = vmatpush3.bf16.xpose.msra.mxu0 %v1810_v8  ;;  %1551 = vmatprep.mubr.msk.bf16.mxu0 %vm1742_vm0, %v1741_v1 }
  0xda   :  { %1561 = vmatprep.subr.bf16.mxu0 %v1741_v1  ;;  %1546 = vmatmul.mubr.msk.bf16.vlgmr.msra.gmra.mxu1 %vm42_vm1, %v1796_v7 }
  0xdb   :  { %1557 = vmatprep.mubr.msk.bf16.mxu1 %vm1742_vm0, %v1741_v1 }
 0x190   :  { %v187_v24 = vpop.f32.mrf.mxu0 }
 0x191   :  { %v188_v25 = vadd.f32 %v187_v24, %v146_v23 }
 0x192   :  { %v1525_v26 = vpop.f32.mrf.mxu0  ;;  %v251_v27 = vpop.f32.mrf.mxu1 }
 0x193   :  { %v194_v28 = vsel %vm193_vm2, %v188_v25, -inf  ;;  %v252_v59 = vadd.f32 %v1385_v58, %v251_v27 }
 0x194   :  { %v1531_v29 = vpop.f32.mrf.mxu1  ;;  %195 = vmax.xlane.f32.xlu1 %v194_v28  ;;  %v190_v30 = vpop.f32.mrf.mxu0  ;;  %v1405_v28 = vld [vmem:[%s2021_s1 + $0x28] sm:$0xff] }
 0x195   :  { %v257_v61 = vsel %vm193_vm2, %v252_v59, -inf }
 0x196   :  { %v1526_v31 = vpop.f32.mrf.mxu0  ;;  %v254_v32 = vpop.f32.mrf.mxu1 }
 0x198   :  { %v1532_v33 = vpop.f32.mrf.mxu1  ;;  %v321_v34 = vpop.f32.mrf.mxu0 }
 0x19a   :  { %v1539_v35 = vpop.f32.mrf.mxu0  ;;  %v379_v62 = vpop.f32.mrf.mxu1 }
 0x19c   :  { %v324_v36 = vpop.f32.mrf.mxu0  ;;  %v1547_v63 = vpop.f32.mrf.mxu1 }
 0x19d   :  { %v1847_v38 = vpack.c.bf16 %v324_v36, %v321_v34 }
 0x19e   :  { %v1540_v39 = vpop.f32.mrf.mxu0  ;;  %v382_v0 = vpop.f32.mrf.mxu1 }
 0x19f   :  { %1552 = vmatmul.mubr.msk.bf16.vlgmr.msra.gmra.mxu0 %vm42_vm1, %v1847_v38  ;;  %v387_v2 = vpack.c.bf16 %v382_v0, %v379_v62  ;;  %v542_v19 = vrot.slane %v1847_v38, 4 }
 0x1a0   :  { %1562 = vmatpush3.bf16.msra.mxu0 %v497_v37  ;;  %1563 = vmatprep.mubr.msk.bf16.mxu0 %vm1742_vm0, %v1741_v1  ;;  %v1548_v3 = vpop.f32.mrf.mxu1 }
 0x1a1   :  { %1573 = vmatprep.subr.bf16.mxu0 %v1741_v1  ;;  %v451_v4 = vsel %vm449_vm3, %v387_v2, 0  ;;  %v600_v14 = vrot.slane %v387_v2, 4 }
 0x1a2   :  { %1556 = vmatpush3.bf16.msra.mxu1 %v451_v4 }
 0x1a3   :  { %1567 = vmatprep.subr.bf16.mxu1 %v1741_v1  ;;  %v605_v18 = vsel %vm449_vm3, %v600_v14, 0  ;;  %v1683_v14 = vld [vmem:[%s2023_s3 + $0x28] sm:$0xff]  }
 0x21d   :  { %v196_v49 = vpop.xlane.xlu1 %195 }
 0x21e   :  { %v197_v50 = vsub.f32 %v188_v25, %v196_v49 }
 0x220   :  { %v198_v53 = vmul.f32 1.442695, %v197_v50 }
 0x25f   :  { %v427_v43 = vpop.f32.mrf.mxu0 }
 0x260   :  { %v428_v44 = vadd.f32 %v1401_v42, %v427_v43 }
 0x261   :  { %v1553_v45 = vpop.f32.mrf.mxu0 }
 0x262   :  { %v433_v46 = vsel %vm193_vm2, %v428_v44, -inf }
 0x263   :  { %434 = vmax.xlane.f32.xlu0 %v433_v46  ;;  %v430_v47 = vpop.f32.mrf.mxu0 }
 0x265   :  { %v1554_v48 = vpop.f32.mrf.mxu0 }
 0x2ec   :  { %v435_v51 = vpop.xlane.xlu0 %434 }
 0x2ed   :  { %v436_v52 = vsub.f32 %v428_v44, %v435_v51  ;;  %v1679_v51 = vld [vmem:[%s2022_s2 + $0x28] sm:$0xff]  }
 0x2ef   :  { %v437_v54 = vmul.f32 1.442695, %v436_v52 }
 0x2f1   :  { %1687 = vpow2.f32 %v437_v54 }
 0x2f2   :  { %1689 = vpow2.f32 %v198_v53 }
 0x2fe   :  { %v1688_v55 = vpop.eup %1687 }
 0x2ff   :  { %v439_v56 = vsel %vm193_vm2, %v1688_v55, 0.0  ;;  %v1690_v57 = vpop.eup %1689 }
 0x300   :  { %440 = vadd.xlane.f32.xlu0 %v439_v56  ;;  %v200_v60 = vsel %vm193_vm2, %v1690_v57, 0.0 }
 0x304   :  { %201 = vadd.xlane.f32.xlu0 %v200_v60 }
 0x308   :  { %258 = vmax.xlane.f32.xlu0 %v257_v61 }
 0x389   :  { %v441_v5 = vpop.xlane.xlu0 %440 }
 0x38a   :  { %1691 = vrcp.f32 %v441_v5 }
 0x38d   :  { %v202_v6 = vpop.xlane.xlu0 %201 }
 0x38e   :  { %1693 = vrcp.f32 %v202_v6 }
 0x391   :  { %v259_v37 = vpop.xlane.xlu0 %258 }
 0x392   :  { %v260_v38 = vsub.f32 %v252_v59, %v259_v37 }
 0x394   :  { %v261_v41 = vmul.f32 1.442695, %v260_v38 }
 0x397   :  { %v1692_v10 = vpop.eup %1691 }
 0x398   :  { %v444_v11 = vmul.f32 %v1692_v10, %v1688_v55  ;;  %v1680_v55 = vld [vmem:[%s2022_s2 + $0x20] sm:$0xff]  }
 0x39a   :  { %v445_v12 = vpack.c.bf16 %v444_v11, %v444_v11  ;;  %v1681_v11 = vld [vmem:[%s2022_s2 + $0x38] sm:$0xff]  }
 0x39b   :  { %v1694_v13 = vpop.eup %1693 }
 0x39c   :  { %1558 = vmatmul.mubr.msk.bf16.vlgmr.msra.gmra.mxu1 %vm193_vm2, %v445_v12  ;;  %v205_v15 = vmul.f32 %v1694_v13, %v1690_v57  ;;  %v1682_v13 = vld [vmem:[%s2022_s2 + $0x30] sm:$0xff]  }
 0x39d   :  { %1568 = vmatpush3.bf16.xpose.msra.mxu1 %v1814_v9  ;;  %1569 = vmatprep.mubr.msk.bf16.mxu1 %vm1742_vm0, %v1741_v1 }
 0x39e   :  { %v206_v16 = vpack.c.bf16 %v205_v15, %v205_v15  ;;  %1579 = vmatprep.subr.bf16.mxu1 %v1741_v1  ;;  %v1684_v15 = vld [vmem:[%s2023_s3 + $0x20] sm:$0xff]  }
 0x3a0   :  { %1564 = vmatmul.mubr.msk.bf16.vlgmr.msra.gmra.mxu0 %vm193_vm2, %v206_v16 }
 0x3a1   :  { %1574 = vmatpush3.bf16.msra.mxu0 %v605_v18  ;;  %1575 = vmatprep.mubr.msk.bf16.mxu0 %vm1742_vm0, %v1741_v1 }
 0x3a2   :  { %1585 = vmatprep.subr.bf16.mxu0 %v1741_v1 }
 0x3a4   :  { %1570 = vmatmul.mubr.msk.bf16.vlgmr.msra.gmra.mxu1 %vm42_vm1, %v542_v19 }
 0x3a5   :  { %1580 = vmatpush3.bf16.msra.mxu1 %v653_v21  ;;  %1581 = vmatprep.mubr.msk.bf16.mxu1 %vm1742_vm0, %v1741_v1 }
 0x3a6   :  { %1593 = vmatprep.subr.bf16.mxu1 %v1741_v1 }
 0x45c   :  { %v487_v20 = vpop.f32.mrf.mxu1 }
 0x45e   :  { %v1559_v22 = vpop.f32.mrf.mxu1 }
 0x45f   :  { %v1426_v22 = vld [vmem:[%s2021_s1 + $0x30] sm:$0xff] }
 0x460   :  { %v490_v23 = vpop.f32.mrf.mxu1  ;;  %v533_v24 = vpop.f32.mrf.mxu0 }
 0x461   :  { %v1895_v25 = vadd.f32 %v533_v24, %v487_v20 }
 0x462   :  { %v1560_v26 = vpop.f32.mrf.mxu1  ;;  %v1565_v27 = vpop.f32.mrf.mxu0 }
 0x464   :  { %v536_v29 = vpop.f32.mrf.mxu0  ;;  %v580_v30 = vpop.f32.mrf.mxu1 }
 0x465   :  { %v581_v31 = vadd.f32 %v1405_v28, %v580_v30 }
 0x466   :  { %v1566_v32 = vpop.f32.mrf.mxu0  ;;  %v1571_v33 = vpop.f32.mrf.mxu1 }
 0x467   :  { %v586_v34 = vsel %vm193_vm2, %v581_v31, -inf }
 0x468   :  { %587 = vmax.xlane.f32.xlu1 %v586_v34  ;;  %v583_v35 = vpop.f32.mrf.mxu1 }
 0x46a   :  { %v1572_v36 = vpop.f32.mrf.mxu1 }
 0x4f1   :  { %v588_v39 = vpop.xlane.xlu1 %587 }
 0x4f2   :  { %v589_v40 = vsub.f32 %v581_v31, %v588_v39 }
 0x4f4   :  { %v590_v42 = vmul.f32 1.442695, %v589_v40 }
 0x4f6   :  { %1695 = vpow2.f32 %v590_v42 }
 0x4f7   :  { %1697 = vpow2.f32 %v261_v41 }
 0x503   :  { %v1696_v43 = vpop.eup %1695 }
 0x504   :  { %v592_v44 = vsel %vm193_vm2, %v1696_v43, 0.0  ;;  %v1698_v45 = vpop.eup %1697 }
 0x505   :  { %593 = vadd.xlane.f32.xlu1 %v592_v44  ;;  %v263_v46 = vsel %vm193_vm2, %v1698_v45, 0.0 }
 0x509   :  { %264 = vadd.xlane.f32.xlu1 %v263_v46 }
 0x58e   :  { %v594_v47 = vpop.xlane.xlu1 %593 }
 0x58f   :  { %1699 = vrcp.f32 %v594_v47 }
 0x592   :  { %v265_v48 = vpop.xlane.xlu1 %264 }
 0x593   :  { %1701 = vrcp.f32 %v265_v48 }
 0x59c   :  { %v1700_v49 = vpop.eup %1699 }
 0x59d   :  { %v597_v50 = vmul.f32 %v1700_v49, %v1696_v43 }
 0x59f   :  { %v598_v52 = vpack.c.bf16 %v597_v50, %v597_v50 }
 0x5a0   :  { %v1702_v53 = vpop.eup %1701 }
 0x5a1   :  { %1576 = vmatmul.mubr.msk.bf16.vlgmr.msra.gmra.mxu0 %vm193_vm2, %v598_v52  ;;  %v268_v54 = vmul.f32 %v1702_v53, %v1698_v45 }
 0x5a2   :  { %1586 = vmatpush3.bf16.msra.mxu0 %v1679_v51  ;;  %1589 = vmatprep.mubr.msk.bf16.mxu0 %vm1742_vm0, %v1741_v1  ;;  %v1443_v51 = vld [vmem:[%s2021_s1 + $0x18] sm:$0xff] }
 0x5a3   :  { %v269_v56 = vpack.c.bf16 %v268_v54, %v268_v54  ;;  %1587 = vmatprep.subr.bf16.mxu0 %v1741_v1 }
 0x5a5   :  { %1582 = vmatmul.mubr.msk.bf16.vlgmr.msra.gmra.mxu1 %vm193_vm2, %v269_v56 }
 0x5a6   :  { %1588 = vmatpush3.bf16.msra.mxu0 %v1680_v55  ;;  %1597 = vmatprep.mubr.msk.bf16.mxu1 %vm1742_vm0, %v1741_v1 }
 0x5a7   :  { %1601 = vmatprep.subr.bf16.mxu0 %v1741_v1  ;;  %1594 = vmatpush3.bf16.msra.mxu1 %v1683_v14 }
 0x5a8   :  { %1595 = vmatprep.subr.bf16.mxu1 %v1741_v1 }
 0x5a9   :  { %1590 = vmatmul.mubr.msk.bf16.vlgmr.msra.gmra.mxu0 %vm42_vm1, %v1796_v7 }
 0x5aa   :  { %1602 = vmatpush3.bf16.xpose.msra.mxu0 %v1810_v8  ;;  %1603 = vmatprep.mubr.msk.bf16.mxu0 %vm1742_vm0, %v1741_v1 }
 0x5ab   :  { %1613 = vmatprep.subr.bf16.mxu0 %v1741_v1  ;;  %1596 = vmatpush3.bf16.msra.mxu1 %v1684_v15  ;;  %v1685_v15 = vld [vmem:[%s2023_s3 + $0x38] sm:$0xff]  }
 0x5ac   :  { %1607 = vmatprep.subr.bf16.mxu1 %v1741_v1 }
 0x5ae   :  { %1598 = vmatmul.mubr.msk.bf16.vlgmr.msra.gmra.mxu1 %vm42_vm1, %v1796_v7 }
 0x5af   :  { %1609 = vmatprep.mubr.msk.bf16.mxu1 %vm1742_vm0, %v1741_v1 }
 0x661   :  { %v641_v57 = vpop.f32.mrf.mxu0 }
 0x663   :  { %v1577_v58 = vpop.f32.mrf.mxu0 }
 0x664   :  { %v1446_v58 = vld [vmem:[%s2021_s1 + $0x38] sm:$0xff] }
 0x665   :  { %v644_v59 = vpop.f32.mrf.mxu0  ;;  %v689_v60 = vpop.f32.mrf.mxu1 }
 0x666   :  { %v1923_v61 = vadd.f32 %v689_v60, %v641_v57 }
 0x667   :  { %v1578_v62 = vpop.f32.mrf.mxu0  ;;  %v1583_v63 = vpop.f32.mrf.mxu1 }
 0x669   :  { %v692_v0 = vpop.f32.mrf.mxu1  ;;  %v746_v2 = vpop.f32.mrf.mxu0 }
 0x66b   :  { %v1584_v3 = vpop.f32.mrf.mxu1  ;;  %v1591_v4 = vpop.f32.mrf.mxu0 }
 0x66d   :  { %v749_v5 = vpop.f32.mrf.mxu0 }
 0x66e   :  { %v811_v6 = vpack.c.bf16 %v749_v5, %v746_v2  ;;  %v804_v45 = vpop.f32.mrf.mxu1 }
 0x66f   :  { %v1592_v10 = vpop.f32.mrf.mxu0 }
 0x670   :  { %1604 = vmatmul.mubr.msk.bf16.vlgmr.msra.gmra.mxu0 %vm42_vm1, %v811_v6  ;;  %v921_v12 = vrot.slane %v811_v6, 4  ;;  %v1599_v46 = vpop.f32.mrf.mxu1 }
 0x671   :  { %1614 = vmatpush3.bf16.xpose.msra.mxu0 %v1814_v9  ;;  %1615 = vmatprep.mubr.msk.bf16.mxu0 %vm1742_vm0, %v1741_v1 }
 0x672   :  { %1625 = vmatprep.subr.bf16.mxu0 %v1741_v1  ;;  %v807_v47 = vpop.f32.mrf.mxu1 }
 0x673   :  { %v812_v48 = vpack.c.bf16 %v807_v47, %v804_v45 }
 0x674   :  { %v1600_v49 = vpop.f32.mrf.mxu1 }
 0x675   :  { %v875_v50 = vsel %vm449_vm3, %v812_v48, 0  ;;  %v979_v6 = vrot.slane %v812_v48, 4 }
 0x676   :  { %1608 = vmatpush3.bf16.msra.mxu1 %v875_v50 }
 0x677   :  { %1619 = vmatprep.subr.bf16.mxu1 %v1741_v1 }
 0x678   :  { %1616 = vmatmul.mubr.msk.bf16.vlgmr.msra.gmra.mxu0 %vm42_vm1, %v921_v12  ;;  %v984_v12 = vsel %vm449_vm3, %v979_v6, 0 }
 0x679   :  { %1626 = vmatpush3.bf16.msra.mxu0 %v1681_v11  ;;  %1629 = vmatprep.mubr.msk.bf16.mxu0 %vm1742_vm0, %v1741_v1 }
 0x67a   :  { %1627 = vmatprep.subr.bf16.mxu0 %v1741_v1 }
 0x67d   :  { %1628 = vmatpush3.bf16.msra.mxu0 %v1682_v13 }
 0x67e   :  { %1641 = vmatprep.subr.bf16.mxu0 %v1741_v1 }
 0x680   :  { %1630 = vmatmul.mubr.msk.bf16.vlgmr.msra.gmra.mxu0 %vm42_vm1, %v1796_v7 }
 0x681   :  { %1642 = vmatpush3.bf16.xpose.msra.mxu0 %v1810_v8  ;;  %1643 = vmatprep.mubr.msk.bf16.mxu0 %vm1742_vm0, %v1741_v1  ;;  %v1423_v8 = vld [vmem:[%s2021_s1 + $0x10] sm:$0xff] }
 0x682   :  { %1653 = vmatprep.subr.bf16.mxu0 %v1741_v1 }
 0x730   :  { %v852_v16 = vpop.f32.mrf.mxu0 }
 0x731   :  { %v853_v17 = vadd.f32 %v1423_v8, %v852_v16  ;;  %v1686_v16 = vld [vmem:[%s2023_s3 + $0x30] sm:$0xff]   ;;  %s1743_s3 = smov [#allocation2]  }
 0x732   :  { %v1605_v18 = vpop.f32.mrf.mxu0  ;;  %s1366_s11 = sshll.u32 %s1743_s3, 4  ;;  %s1367_s11 = int_to_ptr.vmem [resolvable:$true] %s1366_s11 }
 0x733   :  { %v858_v19 = vsel %vm193_vm2, %v853_v17, -inf  ;;  %s1719_s12 = scalar_lea.vmem %s1367_s11, 256  ;;  %p1724_p1 = scmp.lt.s32.totalorder %s1367_s11, %s1367_s11 }
 0x734   :  { %859 = vmax.xlane.f32.xlu0 %v858_v19  ;;  %v855_v21 = vpop.f32.mrf.mxu0  ;;  %p1720_p0 = scmp.ne.s32.totalorder %s1367_s11, %s1719_s12  ;;  %p1725_p2 = scmp.lt.s32.totalorder %s1719_s12, %s1719_s12 }
 0x736   :  { %v1606_v20 = vpop.f32.mrf.mxu0  ;;  %p1726_p3 = por %p1725_p2, %p1724_p1 }
 0x738   :  { %v959_v23 = vpop.f32.mrf.mxu0  ;;  %p1727_p4 = pnand %p1726_p3, %p1720_p0 }
 0x739   :  { %v960_v24 = vadd.f32 %v1426_v22, %v959_v23 }
 0x73a   :  { %v1617_v26 = vpop.f32.mrf.mxu0 }
 0x73b   :  { %v965_v27 = vsel %vm193_vm2, %v960_v24, -inf }
 0x73c   :  { %966 = vmax.xlane.f32.xlu1 %v965_v27  ;;  %v962_v28 = vpop.f32.mrf.mxu0 }
 0x73e   :  { %v1618_v29 = vpop.f32.mrf.mxu0 }
 0x740   :  { %v1078_v30 = vpop.f32.mrf.mxu0 }
 0x742   :  { %v1631_v31 = vpop.f32.mrf.mxu0 }
 0x744   :  { %v1081_v32 = vpop.f32.mrf.mxu0 }
 0x745   :  { %v1143_v33 = vpack.c.bf16 %v1081_v32, %v1078_v30 }
 0x746   :  { %v1632_v34 = vpop.f32.mrf.mxu0 }
 0x747   :  { %1644 = vmatmul.mubr.msk.bf16.vlgmr.msra.gmra.mxu0 %vm42_vm1, %v1143_v33  ;;  %v1253_v35 = vrot.slane %v1143_v33, 4 }
 0x748   :  { %1654 = vmatpush3.bf16.xpose.msra.mxu0 %v1814_v9  ;;  %1655 = vmatprep.mubr.msk.bf16.mxu0 %vm1742_vm0, %v1741_v1 }
 0x74f   :  { %1656 = vmatmul.mubr.msk.bf16.vlgmr.msra.gmra.mxu0 %vm42_vm1, %v1253_v35 }
 0x7bd   :  { %v860_v36 = vpop.xlane.xlu0 %859 }
 0x7be   :  { %v861_v37 = vsub.f32 %v853_v17, %v860_v36 }
 0x7c0   :  { %v862_v38 = vmul.f32 1.442695, %v861_v37 }
 0x7c2   :  { %1703 = vpow2.f32 %v862_v38 }
 0x7c5   :  { %v967_v39 = vpop.xlane.xlu1 %966 }
 0x7c6   :  { %v968_v40 = vsub.f32 %v960_v24, %v967_v39 }
 0x7c8   :  { %v969_v41 = vmul.f32 1.442695, %v968_v40 }
 0x7ca   :  { %1705 = vpow2.f32 %v969_v41 }
 0x7cf   :  { %v1704_v42 = vpop.eup %1703 }
 0x7d0   :  { %v864_v43 = vsel %vm193_vm2, %v1704_v42, 0.0 }
 0x7d1   :  { %865 = vadd.xlane.f32.xlu0 %v864_v43 }
 0x7d7   :  { %v1706_v44 = vpop.eup %1705 }
 0x7d8   :  { %v971_v9 = vsel %vm193_vm2, %v1706_v44, 0.0 }
 0x7d9   :  { %972 = vadd.xlane.f32.xlu1 %v971_v9 }
 0x807   :  { %v1184_v52 = vpop.f32.mrf.mxu0 }
 0x808   :  { %v1185_v53 = vadd.f32 %v1443_v51, %v1184_v52 }
 0x809   :  { %v1645_v54 = vpop.f32.mrf.mxu0 }
 0x80a   :  { %v1190_v55 = vsel %vm193_vm2, %v1185_v53, -inf }
 0x80b   :  { %1191 = vmax.xlane.f32.xlu0 %v1190_v55  ;;  %v1187_v56 = vpop.f32.mrf.mxu0 }
 0x80d   :  { %v1646_v57 = vpop.f32.mrf.mxu0 }
 0x80f   :  { %v1291_v59 = vpop.f32.mrf.mxu0 }
 0x810   :  { %v1292_v60 = vadd.f32 %v1446_v58, %v1291_v59 }
 0x811   :  { %v1657_v62 = vpop.f32.mrf.mxu0 }
 0x812   :  { %v1297_v63 = vsel %vm193_vm2, %v1292_v60, -inf }
 0x813   :  { %1298 = vmax.xlane.f32.xlu1 %v1297_v63  ;;  %v1294_v0 = vpop.f32.mrf.mxu0 }
 0x815   :  { %v1658_v2 = vpop.f32.mrf.mxu0 }
 0x85a   :  { %v866_v3 = vpop.xlane.xlu0 %865 }
 0x85b   :  { %1707 = vrcp.f32 %v866_v3 }
 0x862   :  { %v973_v4 = vpop.xlane.xlu1 %972 }
 0x863   :  { %1709 = vrcp.f32 %v973_v4 }
 0x868   :  { %v1708_v5 = vpop.eup %1707 }
 0x869   :  { %v869_v10 = vmul.f32 %v1708_v5, %v1704_v42 }
 0x86b   :  { %v870_v11 = vpack.c.bf16 %v869_v10, %v869_v10 }
 0x86d   :  { %1610 = vmatmul.mubr.msk.bf16.vlgmr.msra.gmra.mxu1 %vm193_vm2, %v870_v11 }
 0x86e   :  { %1620 = vmatpush3.bf16.msra.mxu1 %v984_v12  ;;  %1621 = vmatprep.mubr.msk.bf16.mxu1 %vm1742_vm0, %v1741_v1 }
 0x86f   :  { %1633 = vmatprep.subr.bf16.mxu1 %v1741_v1 }
 0x870   :  { %v1710_v13 = vpop.eup %1709 }
 0x871   :  { %v976_v14 = vmul.f32 %v1710_v13, %v1706_v44 }
 0x873   :  { %v977_v8 = vpack.c.bf16 %v976_v14, %v976_v14 }
 0x875   :  { %1622 = vmatmul.mubr.msk.bf16.vlgmr.msra.gmra.mxu1 %vm193_vm2, %v977_v8 }
 0x876   :  { %1634 = vmatpush3.bf16.msra.mxu1 %v1685_v15  ;;  %1637 = vmatprep.mubr.msk.bf16.mxu1 %vm1742_vm0, %v1741_v1 }
 0x877   :  { %1635 = vmatprep.subr.bf16.mxu1 %v1741_v1 }
 0x87a   :  { %1636 = vmatpush3.bf16.msra.mxu1 %v1686_v16 }
 0x87b   :  { %1647 = vmatprep.subr.bf16.mxu1 %v1741_v1 }
 0x87d   :  { %1638 = vmatmul.mubr.msk.bf16.vlgmr.msra.gmra.mxu1 %vm42_vm1, %v1796_v7 }
 0x87e   :  { %1649 = vmatprep.mubr.msk.bf16.mxu1 %vm1742_vm0, %v1741_v1 }
 0x894   :  { %v1192_v17 = vpop.xlane.xlu0 %1191 }
 0x895   :  { %v1193_v18 = vsub.f32 %v1185_v53, %v1192_v17 }
 0x897   :  { %v1194_v19 = vmul.f32 1.442695, %v1193_v18 }
 0x899   :  { %1711 = vpow2.f32 %v1194_v19 }
 0x89c   :  { %v1299_v21 = vpop.xlane.xlu1 %1298 }
 0x89d   :  { %v1300_v20 = vsub.f32 %v1292_v60, %v1299_v21 }
 0x89f   :  { %v1301_v22 = vmul.f32 1.442695, %v1300_v20 }
 0x8a1   :  { %1713 = vpow2.f32 %v1301_v22 }
 0x8a6   :  { %v1712_v23 = vpop.eup %1711 }
 0x8a7   :  { %v1196_v24 = vsel %vm193_vm2, %v1712_v23, 0.0 }
 0x8a8   :  { %1197 = vadd.xlane.f32.xlu0 %v1196_v24 }
 0x8ae   :  { %v1714_v26 = vpop.eup %1713 }
 0x8af   :  { %v1303_v27 = vsel %vm193_vm2, %v1714_v26, 0.0 }
 0x8b0   :  { %1304 = vadd.xlane.f32.xlu1 %v1303_v27 }
 0x92d   :  { %v911_v7 = vpop.f32.mrf.mxu1 }
 0x92e   :  { %v917_v28 = vadd.f32 %v911_v7, %v1895_v25 }
 0x92f   :  { %v1611_v29 = vpop.f32.mrf.mxu1 }
 0x931   :  { %v914_v30 = vpop.f32.mrf.mxu1  ;;  %v1198_v31 = vpop.xlane.xlu0 %1197 }
 0x932   :  { %1715 = vrcp.f32 %v1198_v31 }
 0x933   :  { %v1612_v32 = vpop.f32.mrf.mxu1 }
 0x935   :  { %v1020_v33 = vpop.f32.mrf.mxu1 }
 0x936   :  { %v1026_v34 = vadd.f32 %v1020_v33, %v1923_v61 }
 0x937   :  { %v1623_v35 = vpop.f32.mrf.mxu1 }
 0x939   :  { %v1023_v36 = vpop.f32.mrf.mxu1  ;;  %v1305_v37 = vpop.xlane.xlu1 %1304 }
 0x93a   :  { %1717 = vrcp.f32 %v1305_v37 }
 0x93b   :  { %v1624_v38 = vpop.f32.mrf.mxu1 }
 0x93d   :  { %v1136_v39 = vpop.f32.mrf.mxu1 }
 0x93f   :  { %v1716_v40 = vpop.eup %1715  ;;  %v1639_v41 = vpop.f32.mrf.mxu1 }
 0x940   :  { %v1201_v44 = vmul.f32 %v1716_v40, %v1712_v23 }
 0x941   :  { %v1139_v42 = vpop.f32.mrf.mxu1 }
 0x942   :  { %v1144_v43 = vpack.c.bf16 %v1139_v42, %v1136_v39  ;;  %v1202_v46 = vpack.c.bf16 %v1201_v44, %v1201_v44 }
 0x943   :  { %v1640_v25 = vpop.f32.mrf.mxu1 }
 0x944   :  { %v1207_v9 = vsel %vm449_vm3, %v1144_v43, 0  ;;  %v1311_v45 = vrot.slane %v1144_v43, 4 }
 0x945   :  { %1648 = vmatpush3.bf16.msra.mxu1 %v1207_v9 }
 0x946   :  { %1659 = vmatprep.subr.bf16.mxu1 %v1741_v1  ;;  %v1316_v47 = vsel %vm449_vm3, %v1311_v45, 0 }
 0x947   :  { %v1718_v61 = vpop.eup %1717 }
 0x948   :  { %1650 = vmatmul.mubr.msk.bf16.vlgmr.msra.gmra.mxu1 %vm193_vm2, %v1202_v46  ;;  %v1308_v48 = vmul.f32 %v1718_v61, %v1714_v26 }
 0x949   :  { %1660 = vmatpush3.bf16.msra.mxu1 %v1316_v47  ;;  %1661 = vmatprep.mubr.msk.bf16.mxu1 %vm1742_vm0, %v1741_v1 }
 0x94a   :  { %v1309_v49 = vpack.c.bf16 %v1308_v48, %v1308_v48 }
 0x950   :  { %1662 = vmatmul.mubr.msk.bf16.vlgmr.msra.gmra.mxu1 %vm193_vm2, %v1309_v49 }
 0xa08   :  { %v1243_v50 = vpop.f32.mrf.mxu1 }
 0xa09   :  { %v1249_v51 = vadd.f32 %v1243_v50, %v917_v28 }
 0xa0a   :  { %v1651_v52 = vpop.f32.mrf.mxu1 }
 0xa0b   :  { %1359 = vst.msk [vmem:[#allocation2] sm:$0xff] %vm42_vm1, %v1249_v51 }
 0xa0c   :  { %v1246_v53 = vpop.f32.mrf.mxu1 }
 0xa0e   :  { %v1652_v54 = vpop.f32.mrf.mxu1 }
 0xa10   :  { %v1352_v55 = vpop.f32.mrf.mxu1 }
 0xa11   :  { %v1358_v56 = vadd.f32 %v1352_v55, %v1026_v34 }
 0xa12   :  { %v1663_v57 = vpop.f32.mrf.mxu1 }
 0xa13   :  { %1360 = vst.msk [vmem:[#allocation2 + $0x8] sm:$0xff] %vm42_vm1, %v1358_v56 }
 0xa14   :  { %v1355_v1 = vpop.f32.mrf.mxu1 }
 0xa15   :  { %1730 = shalt.err (!%p1727_p4)
}
 0xa16   :  { %s1744_s13 = smov 128   ;;  %s1745_s14 = smov 8   ;;  %v1664_v58 = vpop.f32.mrf.mxu1 }
 0xa17   :  { %1372 = dma.vmem_to_hbm [thread:$0]  %s1367_s11, 256, %s2024_s4, [#allocation3], %s1744_s13, %s1744_s13, %s1745_s14  }
 0xa18   :  { %1739 = dma.done.wait [#allocation3], 256  }
 0xa19   :  { %1740 = vsyncadd [#allocation3], 4294967040 }
 0xa1a   :  { %1376 = vsyncpa [#allocation3], 1 }

</bundles_post_ra>
